<compile_context>
chip_gen: v7x
topology: tpu7x:2x2x1
jax: 0.10.0
libtpu: 0.0.40
codegen_flags: <defaults>
</compile_context>

<pallas_src>
import jax
import jax.numpy as jnp
from jax.experimental import pallas as pl
from jax.experimental.pallas import tpu as pltpu

_NEG_BIG = -1e30


def sentiment_kernel(x_ref, mask_ref, wa_ref, ba_ref, o_ref):
    # x_ref:    (BT, S, D)  native dtype (f32 / bf16)
    # mask_ref: (BT, S)     int32 attention mask (0 == padded)
    # wa_ref:   (1, D)      x.dtype, shared across all grid steps
    # ba_ref:   (1,)        f32 scalar in SMEM
    # o_ref:    (BT, D)     native dtype, lane-dense over D
    x = x_ref[...]
    bt, _, d = x.shape
    wa = jnp.broadcast_to(wa_ref[...].reshape(1, 1, d), (bt, 1, d))

    # Attention scores: batched MXU contraction over D, f32 accumulate.
    raw = jnp.einsum(
        "bsd,bkd->bsk", x, wa, preferred_element_type=jnp.float32
    )[..., 0]                                                    # (BT, S)
    scores = jnp.tanh(raw + ba_ref[0])                           # (BT, S)
    scores = jnp.where(mask_ref[...] == 0, _NEG_BIG, scores)     # masked_fill

    # Softmax along the sequence (lane) axis.
    m = jnp.max(scores, axis=-1, keepdims=True)                  # (BT, 1)
    e = jnp.exp(scores - m)                                      # (BT, S)
    w = e / jnp.sum(e, axis=-1, keepdims=True)                   # (BT, S)

    # Weighted pooling: batched MXU contraction over S, f32 accumulate.
    pooled = jnp.einsum(
        "bqs,bsd->bqd", w[:, None, :].astype(x.dtype), x,
        preferred_element_type=jnp.float32,
    )                                                            # (BT, 1, D)
    o_ref[...] = pooled[:, 0, :].astype(o_ref.dtype)             # (BT, D)


def _pick_batch_tile(B, S, D, itemsize):
    """Batch rows of x per grid step.

    Targets ~4 MiB of x per block (double-buffered input stays well under the
    scoped-VMEM limit), keeps >= 2 grid steps when possible (two TCs on v7x /
    megacore), and keeps the block batch dim a multiple of 8 (or == B) so the
    2-D mask / output blocks satisfy the (8, 128) tiling rule.
    """
    if B <= 8:
        return B
    row_bytes = max(1, S * D * itemsize)
    bt = max(1, (4 << 20) // row_bytes)      # ~4 MiB of x per block
    bt = min(bt, pl.cdiv(B, 2))              # keep >= 2 grid steps
    bt = max(8, (bt // 8) * 8)               # sublane-aligned blocks
    return int(min(bt, B))


def sentiment_learner(x, attention_mask, wa, ba, *, block_b=None):
    """x: (B, S, D) float, attention_mask: (B, S), wa: (D,), ba: (1,)."""
    B, S, D = x.shape
    dtype = x.dtype

    mask_i32 = attention_mask.astype(jnp.int32)
    wa2 = wa.reshape(1, D).astype(dtype)
    ba2 = ba.reshape(1).astype(jnp.float32)

    bt = block_b if block_b is not None else _pick_batch_tile(
        B, S, D, jnp.dtype(dtype).itemsize)
    grid = (pl.cdiv(B, bt),)

    return pl.pallas_call(
        sentiment_kernel,
        out_shape=jax.ShapeDtypeStruct((B, D), dtype),
        grid=grid,
        in_specs=[
            pl.BlockSpec((bt, S, D), lambda i: (i, 0, 0)),          # x
            pl.BlockSpec((bt, S), lambda i: (i, 0)),                # mask
            pl.BlockSpec((1, D), lambda i: (0, 0)),                 # Wa
            pl.BlockSpec(memory_space=pltpu.MemorySpace.SMEM),      # ba scalar
        ],
        out_specs=pl.BlockSpec((bt, D), lambda i: (i, 0)),
        compiler_params=pltpu.CompilerParams(
            dimension_semantics=("parallel",),
            vmem_limit_bytes=32 * 1024 * 1024,
        ),
    )(x, mask_i32, wa2, ba2)


def sentiment_learner_ref(x, attention_mask, wa, ba):
    """Pure-JAX reference matching the PyTorch forward exactly."""
    scores = jnp.tanh(x @ wa.reshape(-1, 1) + ba)[..., 0]        # (B, S)
    scores = jnp.where(attention_mask == 0, -jnp.inf, scores)
    weights = jax.nn.softmax(scores, axis=1)[..., None]          # (B, S, 1)
    return jnp.sum(x * weights, axis=1)                          # (B, D)


if __name__ == "__main__":
    B, S, D = 2, 8, 32
    key = jax.random.PRNGKey(0)
    kx, kw = jax.random.split(key)

    x = jax.random.normal(kx, (B, S, D), dtype=jnp.float32)

    # attention mask: batch 0 fully attended, batch 1 has last 3 positions padded
    attention_mask = jnp.array(
        [[1, 1, 1, 1, 1, 1, 1, 1],
         [1, 1, 1, 1, 1, 0, 0, 0]], dtype=jnp.int32)

    # Parameter init (nn.Linear(D, 1, bias=False) weight + zero ba).
    bound = 1.0 / (D ** 0.5)
    wa = jax.random.uniform(kw, (D,), dtype=jnp.float32, minval=-bound, maxval=bound)
    ba = jnp.zeros((1,), dtype=jnp.float32)

    out = jax.block_until_ready(sentiment_learner(x, attention_mask, wa, ba))
    ref = sentiment_learner_ref(x, attention_mask, wa, ba)

    assert out.shape == (B, D)
    assert jnp.allclose(out, ref, atol=1e-5, rtol=1e-5), "mismatch vs reference"
    print("KERNEL_OK")
</pallas_src>

<mosaic_0001>
module attributes {stable_mosaic.version = 11 : i64} {
  func.func @sentiment_kernel(%arg0: i32, %arg1: memref<2x8x32xf32, #tpu.memory_space<vmem>>, %arg2: memref<2x8xi32, #tpu.memory_space<vmem>>, %arg3: memref<1x32xf32, #tpu.memory_space<vmem>>, %arg4: memref<1xf32, #tpu.memory_space<smem>>, %arg5: memref<2x32xf32, #tpu.memory_space<vmem>>) attributes {dimension_semantics = [#tpu.dimension_semantics<parallel>], iteration_bounds = array<i64: 1>, scalar_prefetch = 0 : i64, scratch_operands = 0 : i64, tpu.core_type = #tpu.core_type<tc>, window_params = [{transform_indices = @transform_0, window_bounds = array<i64: 2, 8, 32>}, {transform_indices = @transform_1, window_bounds = array<i64: 2, 8>}, {pipeline_mode = #tpu.pipeline_mode<synchronous>, transform_indices = @transform_2, window_bounds = array<i64: 1, 32>}, {transform_indices = @transform_3, window_bounds = array<i64: 1>}, {transform_indices = @transform_4, window_bounds = array<i64: 2, 32>}]} {
    %c0 = arith.constant 0 : index
    %c0_0 = arith.constant 0 : index
    %c0_1 = arith.constant 0 : index
    %0 = vector.load %arg1[%c0, %c0_0, %c0_1] : memref<2x8x32xf32, #tpu.memory_space<vmem>>, vector<2x8x32xf32>
    %c0_2 = arith.constant 0 : index
    %c0_3 = arith.constant 0 : index
    %1 = vector.load %arg3[%c0_2, %c0_3] : memref<1x32xf32, #tpu.memory_space<vmem>>, vector<1x32xf32>
    %2 = vector.shape_cast %1 : vector<1x32xf32> to vector<1x1x32xf32>
    %3 = vector.shape_cast %2 : vector<1x1x32xf32> to vector<1x1x32xf32>
    %4 = vector.broadcast %3 : vector<1x1x32xf32> to vector<2x1x32xf32>
    "tpu.trace_start"() <{level = 10 : i32, message = "bsd,bkd->bsk"}> : () -> ()
    %cst = arith.constant dense<0.000000e+00> : vector<2x8x1xf32>
    %5 = tpu.matmul %0, %4, %cst {dimension_numbers = #tpu.dot_dimension_numbers<[2], [2], [1], [1], [0, 0, 0, 1, 1, 1], [0], [0]>} : vector<2x8x32xf32>, vector<2x1x32xf32>, vector<2x8x1xf32> -> vector<2x8x1xf32>
    "tpu.trace_stop"() : () -> ()
    %6 = vector.shape_cast %5 : vector<2x8x1xf32> to vector<2x8xf32>
    %c0_4 = arith.constant 0 : index
    %7 = memref.load %arg4[%c0_4] : memref<1xf32, #tpu.memory_space<smem>>
    %8 = vector.broadcast %7 : f32 to vector<2x8xf32>
    %9 = arith.addf %6, %8 : vector<2x8xf32>
    %10 = math.tanh %9 : vector<2x8xf32>
    %c0_5 = arith.constant 0 : index
    %c0_6 = arith.constant 0 : index
    %11 = vector.load %arg2[%c0_5, %c0_6] : memref<2x8xi32, #tpu.memory_space<vmem>>, vector<2x8xi32>
    %c0_i32 = arith.constant 0 : i32
    %12 = vector.broadcast %c0_i32 : i32 to vector<2x8xi32>
    %13 = arith.cmpi eq, %11, %12 : vector<2x8xi32>
    %cst_7 = arith.constant -1.000000e+30 : f32
    %14 = vector.broadcast %cst_7 : f32 to vector<2x8xf32>
    %15 = arith.select %13, %14, %10 : vector<2x8xi1>, vector<2x8xf32>
    %cst_8 = arith.constant dense<0xFF800000> : vector<2xf32>
    %16 = vector.multi_reduction <maximumf>, %15, %cst_8 [1] : vector<2x8xf32> to vector<2xf32>
    %17 = vector.shape_cast %16 : vector<2xf32> to vector<2x1xf32>
    %18 = vector.broadcast %17 : vector<2x1xf32> to vector<2x8xf32>
    %19 = arith.subf %15, %18 : vector<2x8xf32>
    %20 = math.exp %19 : vector<2x8xf32>
    %cst_9 = arith.constant dense<0.000000e+00> : vector<2xf32>
    %21 = vector.multi_reduction <add>, %20, %cst_9 [1] : vector<2x8xf32> to vector<2xf32>
    %22 = vector.shape_cast %21 : vector<2xf32> to vector<2x1xf32>
    %23 = vector.broadcast %22 : vector<2x1xf32> to vector<2x8xf32>
    %24 = arith.divf %20, %23 : vector<2x8xf32>
    %25 = vector.shape_cast %24 : vector<2x8xf32> to vector<2x1x8xf32>
    "tpu.trace_start"() <{level = 10 : i32, message = "bqs,bsd->bqd"}> : () -> ()
    %cst_10 = arith.constant dense<0.000000e+00> : vector<2x1x32xf32>
    %26 = tpu.matmul %25, %0, %cst_10 {dimension_numbers = #tpu.dot_dimension_numbers<[2], [1], [1], [2], [0, 0, 0, 1, 1, 2], [0], [0]>} : vector<2x1x8xf32>, vector<2x8x32xf32>, vector<2x1x32xf32> -> vector<2x1x32xf32>
    "tpu.trace_stop"() : () -> ()
    %27 = vector.shape_cast %26 : vector<2x1x32xf32> to vector<2x32xf32>
    %c0_11 = arith.constant 0 : index
    %c0_12 = arith.constant 0 : index
    %28 = vector.load %arg5[%c0_11, %c0_12] : memref<2x32xf32, #tpu.memory_space<vmem>>, vector<2x32xf32>
    tpu.vector_store %arg5[%c0_11, %c0_12], %27 {strides = array<i32>} : memref<2x32xf32, #tpu.memory_space<vmem>>, vector<2x32xf32>,
    return
  }
  func.func @transform_0(%arg0: i32) -> (i32, i32, i32) {
    %c0_i32 = arith.constant 0 : i32
    %c0_i32_0 = arith.constant 0 : i32
    %c0_i32_1 = arith.constant 0 : i32
    return %arg0, %c0_i32, %c0_i32_0 : i32, i32, i32
  }
  func.func @transform_1(%arg0: i32) -> (i32, i32) {
    %c0_i32 = arith.constant 0 : i32
    %c0_i32_0 = arith.constant 0 : i32
    return %arg0, %c0_i32 : i32, i32
  }
  func.func @transform_2(%arg0: i32) -> (i32, i32) {
    %c0_i32 = arith.constant 0 : i32
    %c0_i32_0 = arith.constant 0 : i32
    %c0_i32_1 = arith.constant 0 : i32
    return %c0_i32, %c0_i32_0 : i32, i32
  }
  func.func @transform_3(%arg0: i32) -> i32 {
    %c0_i32 = arith.constant 0 : i32
    %c0_i32_0 = arith.constant 0 : i32
    return %c0_i32 : i32
  }
  func.func @transform_4(%arg0: i32) -> (i32, i32) {
    %c0_i32 = arith.constant 0 : i32
    %c0_i32_0 = arith.constant 0 : i32
    return %arg0, %c0_i32 : i32, i32
  }
}

</mosaic_0001>

<bundles_post_ra>
// kernel: tpu_custom_call.1
= control target key start
LH: loop header
LB: loop body
LE: loop exit
PB: predicated region body
PF: predicated region fallthrough
CT: control target
= control target key end

     0   :  { %10 = vsyncpa [#allocation4], 0  ;;  %s434_s0 = inlined_call_operand.hbm [shape: f32[2,8,32], index: 0, kind: input, shape index: {}]   ;;  %s435_s1 = inlined_call_operand.vmem [shape: s32[2,8], index: 1, kind: input, shape index: {}]   ;;  %s436_s2 = inlined_call_operand.vmem [shape: f32[1,32], index: 2, kind: input, shape index: {}]   ;;  %s437_s3 = inlined_call_operand.<no memory space> [shape: f32[1], index: 3, kind: input, shape index: {}]   ;;  %s438_s4 = inlined_call_operand.hbm [shape: f32[2,32], index: 4, kind: output, shape index: {}]  }
   0x1   :  { %11 = vsyncpa [#allocation5], 0  ;;  %s366_s15 = smov [#allocation3]   ;;  %s318_s19 = scalar_lea.hbm %s434_s0, 256 }
   0x2   :  { %s17_s16 = sshll.u32 %s366_s15, 4  ;;  %p319_p0 = scmp.ne.s32.totalorder %s434_s0, %s318_s19  ;;  %s18_s16 = int_to_ptr.vmem [resolvable:$true] %s17_s16 }
   0x3   :  { %p322_p1 = scmp.lt.u32.totalorder %s318_s19, %s434_s0 }
   0x5   :  { %p324_p2 = pnand %p322_p1, %p319_p0 }
   0x7   :  { %327 = shalt.err (!%p324_p2)
}
   0x8   :  { %s328_s24 = scalar_lea.vmem %s18_s16, 256  ;;  %p333_p4 = scmp.lt.s32.totalorder %s18_s16, %s18_s16 }
   0x9   :  { %p329_p3 = scmp.ne.s32.totalorder %s18_s16, %s328_s24  ;;  %p334_p5 = scmp.lt.s32.totalorder %s328_s24, %s328_s24 }
   0xb   :  { %p335_p6 = por %p334_p5, %p333_p4 }
   0xd   :  { %p336_p7 = pnand %p335_p6, %p329_p3 }
   0xf   :  { %339 = shalt.err (!%p336_p7)
}
  0x10   :  { %s367_s25 = smov 128   ;;  %s368_s26 = smov 8  }
  0x11   :  { %23 = dma.hbm_to_vmem [thread:$0]  %s434_s0, 256, %s18_s16, [#allocation4], %s367_s25, %s367_s25, %s368_s26  }
  0x12   :  { %362 = dma.done.wait [#allocation4], 256  }
  0x13   :  { %363 = vsyncadd [#allocation4], 4294967040  ;;  %v33_v0 = vld [vmem:[#allocation3] sm:$0xff]  ;;  %vm43_vm0 = vcmask 261120   ;;  %v34_v2 = vld [vmem:[#allocation3 + $0x8] sm:$0xff]  ;;  %v369_v7 = vmov 0   ;;  %v52_v8 = vstv %s437_s3  ;;  %v67_v15 = vlaneseq }
  0x14   :  { %v283_v1 = vld [vmem:[%s436_s2] ss:$0 sm:$0xff]  ;;  %308 = vset.pattern.permute.xlu1 %v369_v7  ;;  %309 = vset.pattern.permute.xlu0 %v369_v7  ;;  %vm77_vm1 = vcmask 1041409   ;;  %vm81_vm3 = vcmask 58368   ;;  %v370_v32 = vmov 0.0   ;;  %vm371_vm4 = vmmov 0  }
  0x15   :  { %v42_v3 = vmul.f32 %v283_v1, %v33_v0  ;;  %v47_v4 = vmul.f32 %v283_v1, %v34_v2  ;;  %v68_v16 = vand.u32 127, %v67_v15  ;;  %v70_v17 = vshrl.u32 %v67_v15, 7  ;;  %v57_v20 = vld [vmem:[%s435_s1] sm:$0x3]  ;;  %290 = vmatprep.subr.mxu0 %v370_v32  ;;  %292 = vmatprep.mubr.msk.f32.mxu0 %vm371_vm4, %v370_v32  ;;  %s373_s1 = smov [#allocation6]  }
  0x16   :  { %vm58_vm2 = vcmp.eq.s32.totalorder %v57_v20, 0  ;;  %291 = vmatpush3.msra.mxu0 %v33_v0  ;;  %295 = vmatprep.subr.mxu1 %v370_v32  ;;  %v372_v34 = vmov 1966171168   ;;  %vm116_vm5 = vcmask 64512   ;;  %s274_s3 = sshll.u32 %s373_s1, 4  ;;  %vm266_vm6 = vcmask 254976   ;;  %s275_s3 = int_to_ptr.vmem [resolvable:$true] %s274_s3 }
  0x17   :  { %v44_v5 = vsel %vm43_vm0, %v42_v3, 0.0  ;;  %v48_v6 = vsel %vm43_vm0, %v47_v4, 0.0  ;;  %v71_v19 = vsub.s32 %v68_v16, %v70_v17  ;;  %296 = vmatpush3.msra.mxu1 %v34_v2  ;;  %297 = vmatprep.mubr.msk.f32.mxu1 %vm371_vm4, %v370_v32  ;;  %v95_v35 = vunpack.c.l.s4 %v372_v34  ;;  %s340_s7 = scalar_lea.vmem %s275_s3, 32  ;;  %p345_p9 = scmp.lt.s32.totalorder %s275_s3, %s275_s3 }
  0x18   :  { %45 = vadd.xlane.f32.xlu0 %v44_v5  ;;  %p341_p8 = scmp.ne.s32.totalorder %s275_s3, %s340_s7  ;;  %p346_p10 = scmp.lt.s32.totalorder %s340_s7, %s340_s7 }
  0x19   :  { %v96_v36 = vunpack.c.0.s8 %v95_v35 }
  0x1a   :  { %p347_p11 = por %p346_p10, %p345_p9 }
  0x1b   :  { %v99_v37 = vsub.s32 %v96_v36, %v70_v17 }
  0x1c   :  { %49 = vadd.xlane.f32.xlu0 %v48_v6  ;;  %p348_p12 = pnand %p347_p11, %p341_p8 }
  0xa5   :  { %v46_v9 = vpop.xlane.xlu0 %45 }
  0xa6   :  { %v53_v10 = vadd.f32 %v52_v8, %v46_v9 }
  0xa8   :  { %310 = vtanh.f32 %v53_v10 }
  0xa9   :  { %v50_v11 = vpop.xlane.xlu0 %49 }
  0xaa   :  { %v54_v12 = vadd.f32 %v52_v8, %v50_v11 }
  0xac   :  { %312 = vtanh.f32 %v54_v12 }
  0xb2   :  { %v311_v13 = vpop.eup %310 }
  0xb3   :  { %62 = vperm.xlu1 %308, %v311_v13  }
  0xb6   :  { %v313_v14 = vpop.eup %312 }
  0xb7   :  { %65 = vperm.xlu1 %308, %v313_v14  }
 0x132   :  { %v63_v18 = vpop.permute.xlu1 %62 }
 0x133   :  { %v72_v22 = vrot.slane %v63_v18, %v71_v19 }
 0x136   :  { %v66_v21 = vpop.permute.xlu1 %65 }
 0x137   :  { %v76_v23 = vrot.slane %v66_v21, %v71_v19 }
 0x139   :  { %v78_v24 = vsel %vm77_vm1, %v76_v23, %v72_v22 }
 0x13a   :  { %v80_v25 = vsel %vm58_vm2, -1e+30, %v78_v24 }
 0x13b   :  { %v82_v26 = vsel %vm81_vm3, %v80_v25, -inf }
 0x13c   :  { %83 = vmax.xlane.f32.xlu0 %v82_v26 }
 0x1c9   :  { %v84_v27 = vpop.xlane.xlu0 %83 }
 0x1ca   :  { %v85_v28 = vsub.f32 %v80_v25, %v84_v27 }
 0x1cc   :  { %v86_v29 = vmul.f32 1.442695, %v85_v28 }
 0x1ce   :  { %314 = vpow2.f32 %v86_v29 }
 0x1d8   :  { %v315_v30 = vpop.eup %314 }
 0x1d9   :  { %v88_v31 = vsel %vm81_vm3, %v315_v30, 0.0 }
 0x1da   :  { %89 = vadd.xlane.f32.xlu1 %v88_v31 }
 0x267   :  { %v90_v33 = vpop.xlane.xlu1 %89 }
 0x268   :  { %316 = vrcp.f32 %v90_v33 }
 0x272   :  { %v317_v38 = vpop.eup %316 }
 0x273   :  { %v92_v39 = vmul.f32 %v317_v38, %v315_v30 }
 0x275   :  { %v100_v40 = vrot.slane %v92_v39, %v99_v37 }
 0x277   :  { %v108_v41 = vrot.slane %v100_v40, %v99_v37  ;;  %v101_v42 = vcombine.high %v100_v40, %v100_v40 }
 0x279   :  { %293 = vmatmul.mubr.msk.f32.vlgmr.msra.gmra.mrb[0].mxu0 %vm116_vm5, %v108_v41  ;;  %v115_v43 = vrot.slane %v101_v42, %v99_v37 }
 0x27b   :  { %298 = vmatmul.mubr.msk.f32.vlgmr.msra.gmra.mrb[0].mxu1 %vm116_vm5, %v115_v43 }
 0x34c   :  { %v185_v44 = vpop.f32.mrb[0].mxu0 }
 0x34d   :  { %v294_v45 = vpop.f32.mrb[1].mxu0 }
 0x34e   :  { %v257_v46 = vpop.f32.mrb[0].mxu1 }
 0x34f   :  { %v263_v47 = vrot.slane %v257_v46, 7  ;;  %v299_v48 = vpop.f32.mrb[1].mxu1 }
 0x351   :  { %v264_v49 = vsel %vm77_vm1, %v263_v47, %v185_v44 }
 0x352   :  { %267 = vst.msk [vmem:[#allocation6] sm:$0x3] %vm266_vm6, %v264_v49 }
 0x353   :  { %351 = shalt.err (!%p348_p12)
}
 0x354   :  { %s352_s10 = scalar_lea.hbm %s438_s4, 32 }
 0x355   :  { %p353_p13 = scmp.ne.s32.totalorder %s438_s4, %s352_s10  ;;  %p356_p0 = scmp.lt.u32.totalorder %s352_s10, %s438_s4 }
 0x357   :  { %p358_p1 = pnand %p356_p0, %p353_p13 }
 0x359   :  { %361 = shalt.err (!%p358_p1)
}
 0x35a   :  { %277 = dma.vmem_to_hbm [thread:$0]  %s275_s3, 32, %s438_s4, [#allocation5]  }
 0x35b   :  { %364 = dma.done.wait [#allocation5], 32  }
 0x35c   :  { %365 = vsyncadd [#allocation5], 4294967264 }
 0x35d   :  { %281 = vsyncpa [#allocation4], 1 }
 0x35e   :  { %282 = vsyncpa [#allocation5], 1 }

</bundles_post_ra>
